<compile_context>
chip_gen: v7x
topology: tpu7x:2x2x1
jax: 0.10.0
libtpu: 0.0.40
codegen_flags: <defaults>
</compile_context>

<pallas_src>
import math
import functools
from typing import NamedTuple, Tuple

import jax
import jax.numpy as jnp
from jax.experimental import pallas as pl
from jax.experimental.pallas import tpu as pltpu


def _round_up(n, m):
    return ((n + m - 1) // m) * m


class NetLayout(NamedTuple):
    t_dim: int
    hidden: int
    out_dim: int
    out_pad: int
    xs_w: int        # x_dim + s_dim
    in_w: int        # packed input lane width
    action_dim: int
    state_dim: int
    w_offsets: Tuple[int, int, int, int, int, int]  # tw1, w_tm, w_xs, w_m1xs, m2, m3


# ----------------------------------------------------------------------------
# Kernel
# ----------------------------------------------------------------------------
def _mish_fast(v):
    # Mish(x) = x * tanh(softplus(x)) = x * ((1+e^x)^2 - 1) / ((1+e^x)^2 + 1)
    # 1 EUP exp + 1 approx reciprocal instead of exp + log + tanh.
    e = jnp.exp(jnp.minimum(v, 20.0))
    n = (1.0 + e) * (1.0 + e)
    return v * (n - 1.0) * pl.reciprocal(n + 1.0, approx=True)


def _make_kernel(layout: NetLayout):
    t_dim = layout.t_dim
    half = t_dim // 2
    hidden = layout.hidden
    out_pad = layout.out_pad
    xs_w = layout.xs_w
    in_w = layout.in_w
    tw1_o, wtm_o, wxs_o, wm1_o, m2_o, m3_o = layout.w_offsets

    def kernel(in_ref, w_ref, b_ref, out_ref):
        f32 = jnp.float32
        bf16 = jnp.bfloat16

        v = in_ref[...]                                   # (tb, in_w) f32 packed input

        # Resident bias buffer: one bias per row (static, free slices).
        freqs = b_ref[0:1, 0:t_dim]                       # duplicated freqs [f | f]
        tb1 = b_ref[1:2, 0:2 * t_dim]
        b_xs = b_ref[2:3, 0:xs_w]
        mb1 = b_ref[3:4, 0:hidden]                        # mb1 + tb2 @ m1t (folded)
        mb2 = b_ref[4:5, 0:hidden]
        mb3 = b_ref[5:6, 0:out_pad]

        # ---- SinusoidalPosEmb + time_mlp Linear(t_dim, 2*t_dim) -> Mish ----
        # [sin(emb), cos(emb)] built with a lane-select (no concat, one dot).
        time_col = v[:, 0:1]                              # (tb, 1)
        emb = time_col * freqs                            # (tb, t_dim)
        lane = jax.lax.broadcasted_iota(jnp.int32, emb.shape, 1)
        t_emb = jnp.where(lane < half, jnp.sin(emb), jnp.cos(emb))
        t_h = _mish_fast(
            jnp.dot(t_emb.astype(bf16), w_ref[tw1_o:tw1_o + t_dim, 0:2 * t_dim],
                    preferred_element_type=f32) + tb1)

        # ---- extractor_x + extractor_state fused (block-diagonal weight on the
        #      packed input; time/pad lanes hit zero rows) -> Mish ----
        xs = _mish_fast(
            jnp.dot(v.astype(bf16), w_ref[wxs_o:wxs_o + in_w, 0:xs_w],
                    preferred_element_type=f32) + b_xs)   # (tb, x_dim + s_dim)

        # ---- mid_layer[0] (time_mlp layer-2 algebraically folded in) ----
        h = _mish_fast(
            jnp.dot(xs.astype(bf16), w_ref[wm1_o:wm1_o + xs_w, 0:hidden],
                    preferred_element_type=f32)
            + jnp.dot(t_h.astype(bf16), w_ref[wtm_o:wtm_o + 2 * t_dim, 0:hidden],
                      preferred_element_type=f32)
            + mb1)

        # ---- mid_layer[2]: Linear(hidden, hidden) -> Mish ----
        h = _mish_fast(
            jnp.dot(h.astype(bf16), w_ref[m2_o:m2_o + hidden, 0:hidden],
                    preferred_element_type=f32) + mb2)

        # ---- mid_layer[4]: Linear(hidden, action_dim [lane-padded]) -> Tanh ----
        y = jnp.dot(h.astype(bf16), w_ref[m3_o:m3_o + hidden, 0:out_pad],
                    preferred_element_type=f32) + mb3
        out_ref[...] = jnp.tanh(y).astype(out_ref.dtype)

    return kernel


# ----------------------------------------------------------------------------
# Parameters (PyTorch-style init; weights stored as (in_features, out_features))
# ----------------------------------------------------------------------------
def init_params(key, state_dim, action_dim, hidden_dim=256, t_dim=16,
                s_dim=128, x_dim=64):
    ks = jax.random.split(key, 8)

    def lin(k, fan_in, fan_out):
        kw, kb = jax.random.split(k)
        bound = 1.0 / math.sqrt(fan_in)
        w = jax.random.uniform(kw, (fan_in, fan_out), jnp.float32, -bound, bound)
        b = jax.random.uniform(kb, (1, fan_out), jnp.float32, -bound, bound)
        return w, b

    p = {}
    p["tw1"], p["tb1"] = lin(ks[0], t_dim, t_dim * 2)
    p["tw2"], p["tb2"] = lin(ks[1], t_dim * 2, t_dim)
    p["xw"], p["xb"] = lin(ks[2], action_dim, x_dim)
    p["sw"], p["sb"] = lin(ks[3], state_dim, s_dim)
    in_dim = s_dim + x_dim + t_dim
    p["m1"], p["mb1"] = lin(ks[4], in_dim, hidden_dim)
    p["m2"], p["mb2"] = lin(ks[5], hidden_dim, hidden_dim)
    p["m3"], p["mb3"] = lin(ks[6], hidden_dim, action_dim)

    half = t_dim // 2
    scale = math.log(10000.0) / max(half - 1, 1)          # guard t_dim == 2
    p["freqs"] = jnp.exp(-scale * jnp.arange(half, dtype=jnp.float32))[None, :]
    return p


def prepare_kernel_params(p):
    """Fold/fuse weights and pack into one bf16 buffer + one f32 bias buffer."""
    f32, bf16 = jnp.float32, jnp.bfloat16
    action_dim, x_dim = p["xw"].shape
    state_dim, s_dim = p["sw"].shape
    t_dim = p["tw1"].shape[0]
    hidden = p["m1"].shape[1]
    out_dim = p["m3"].shape[1]

    out_pad = max(128, _round_up(out_dim, 128))
    xs_w = x_dim + s_dim
    in_w = _round_up(8 + action_dim + state_dim, 8)        # time@0, x@8, state@8+A

    # ---- algebraic folds (exact in f32) ----
    m1x = p["m1"][:x_dim]
    m1t = p["m1"][x_dim:x_dim + t_dim]
    m1s = p["m1"][x_dim + t_dim:]
    w_tm = p["tw2"] @ m1t                                  # (2*t_dim, hidden)
    mb1_f = p["mb1"] + p["tb2"] @ m1t                      # (1, hidden)

    # fused extractor weight: block-diagonal over packed-input lanes
    w_xs = jnp.zeros((in_w, xs_w), f32)
    w_xs = w_xs.at[8:8 + action_dim, :x_dim].set(p["xw"])
    w_xs = w_xs.at[8 + action_dim:8 + action_dim + state_dim, x_dim:].set(p["sw"])
    b_xs = jnp.concatenate([p["xb"], p["sb"]], axis=1)     # (1, xs_w)

    w_m1xs = jnp.concatenate([m1x, m1s], axis=0)           # (xs_w, hidden)

    m3_pad = jnp.zeros((hidden, out_pad), f32).at[:, :out_dim].set(p["m3"])
    mb3_pad = jnp.zeros((1, out_pad), f32).at[:, :out_dim].set(p["mb3"])

    # ---- pack bf16 weights into one (rows, LW) buffer, 16-row aligned ----
    LW = max(256, _round_up(max(2 * t_dim, xs_w, hidden, out_pad), 128))
    blocks = [p["tw1"], w_tm, w_xs, w_m1xs, p["m2"], m3_pad]
    offsets, off = [], 0
    for blk in blocks:
        offsets.append(off)
        off += _round_up(blk.shape[0], 16)
    total_rows = _round_up(off, 16)
    w_packed = jnp.zeros((total_rows, LW), f32)
    for blk, o in zip(blocks, offsets):
        w_packed = w_packed.at[o:o + blk.shape[0], :blk.shape[1]].set(blk)
    w_packed = w_packed.astype(bf16)

    # ---- pack f32 biases (+ duplicated freqs) into one (8, LW) buffer ----
    freqs_dup = jnp.concatenate([p["freqs"], p["freqs"]], axis=1)   # (1, t_dim)
    b_rows = [freqs_dup, p["tb1"], b_xs, mb1_f, p["mb2"], mb3_pad]
    b_packed = jnp.zeros((8, LW), f32)
    for i, r in enumerate(b_rows):
        b_packed = b_packed.at[i, :r.shape[1]].set(r[0])

    layout = NetLayout(t_dim=t_dim, hidden=hidden, out_dim=out_dim,
                       out_pad=out_pad, xs_w=xs_w, in_w=in_w,
                       action_dim=action_dim, state_dim=state_dim,
                       w_offsets=tuple(offsets))
    return {"w": w_packed, "b": b_packed, "layout": layout}


# ----------------------------------------------------------------------------
# Wrapper
# ----------------------------------------------------------------------------
@functools.partial(jax.jit, static_argnames=("layout", "batch_tile"))
def diffusion_net_forward(x, time, state, w_packed, b_packed, *, layout,
                          batch_tile=512):
    B = x.shape[0]
    A, S = layout.action_dim, layout.state_dim
    in_w, out_pad = layout.in_w, layout.out_pad

    # Batch tiling: multiples of 16 (bf16 sublane packing), minimal padding
    # waste, and >= 2 grid steps when padded batch >= 32 so both v7x TCs work.
    ALIGN = 16
    b_min = _round_up(max(B, ALIGN), ALIGN)
    bt = max(ALIGN, _round_up(batch_tile, ALIGN))
    n_tiles = -(-b_min // bt)
    if b_min >= 2 * ALIGN:
        n_tiles = max(n_tiles, 2)
    tb = _round_up(-(-b_min // n_tiles), ALIGN)
    b_pad = _round_up(b_min, tb)
    grid = (b_pad // tb,)

    # One lane-contiguous f32 input: [time | pad | x | state | pad]
    packed = jnp.concatenate([
        time.reshape(B, 1).astype(jnp.float32),
        jnp.zeros((B, 7), jnp.float32),
        x.reshape(B, A).astype(jnp.float32),
        state.reshape(B, S).astype(jnp.float32),
    ], axis=1)
    packed = jnp.pad(packed, ((0, b_pad - B), (0, in_w - packed.shape[1])))

    kernel = _make_kernel(layout)

    out = pl.pallas_call(
        kernel,
        out_shape=jax.ShapeDtypeStruct((b_pad, out_pad), jnp.bfloat16),
        grid=grid,
        in_specs=[
            pl.BlockSpec((tb, in_w), lambda i: (i, 0)),         # per-tile input
            pl.BlockSpec(w_packed.shape, lambda i: (0, 0)),     # resident weights
            pl.BlockSpec(b_packed.shape, lambda i: (0, 0)),     # resident biases
        ],
        out_specs=pl.BlockSpec((tb, out_pad), lambda i: (i, 0)),
        compiler_params=pltpu.CompilerParams(
            dimension_semantics=("parallel",)),
    )(packed, w_packed, b_packed)

    return out[:B, :layout.out_dim].astype(jnp.float32)


# ----------------------------------------------------------------------------
# Pure-JAX f32 reference (mirrors the PyTorch module)
# ----------------------------------------------------------------------------
def _mish_ref(v):
    return v * jnp.tanh(jax.nn.softplus(v))


def reference_forward(x, time, state, params):
    B = x.shape[0]
    emb = time.reshape(B, 1) * params["freqs"]
    t_emb = jnp.concatenate([jnp.sin(emb), jnp.cos(emb)], axis=-1)
    t_h = _mish_ref(t_emb @ params["tw1"] + params["tb1"])
    t_feat = t_h @ params["tw2"] + params["tb2"]
    x_feat = _mish_ref(x @ params["xw"] + params["xb"])
    s_feat = _mish_ref(state.reshape(B, -1) @ params["sw"] + params["sb"])
    inp = jnp.concatenate([x_feat, t_feat, s_feat], axis=1)
    h = _mish_ref(inp @ params["m1"] + params["mb1"])
    h = _mish_ref(h @ params["m2"] + params["mb2"])
    return jnp.tanh(h @ params["m3"] + params["mb3"])


# ----------------------------------------------------------------------------
if __name__ == "__main__":
    B = 2
    STATE_DIM = 16
    ACTION_DIM = 8
    HIDDEN_DIM = 256
    T_DIM = 16
    S_DIM = 128
    X_DIM = 64

    key = jax.random.PRNGKey(0)
    k_params, k_x, k_t, k_s = jax.random.split(key, 4)

    params = init_params(k_params, STATE_DIM, ACTION_DIM, HIDDEN_DIM,
                         T_DIM, S_DIM, X_DIM)
    kp = prepare_kernel_params(params)

    x = jax.random.normal(k_x, (B, ACTION_DIM), jnp.float32)
    time = jax.random.uniform(k_t, (B,), jnp.float32, 0.0, 100.0)
    state = jax.random.normal(k_s, (B, STATE_DIM), jnp.float32)

    out = diffusion_net_forward(x, time, state, kp["w"], kp["b"],
                                layout=kp["layout"])
    out = jax.block_until_ready(out)

    ref = reference_forward(x, time, state, params)
    assert out.shape == (B, ACTION_DIM), out.shape
    max_err = float(jnp.max(jnp.abs(out - ref)))
    # bf16 weights + bf16 MXU activations + bf16 output + approx reciprocal in
    # Mish vs. the pure-f32 reference; tanh-bounded outputs stay within ~1e-2.
    assert max_err < 3e-2, f"mismatch vs reference: max abs err {max_err}"

    print("KERNEL_OK")
</pallas_src>

<mosaic_0001>
module attributes {stable_mosaic.version = 11 : i64} {
  func.func @kernel(%arg0: i32, %arg1: memref<16x32xf32, #tpu.memory_space<vmem>>, %arg2: memref<784x256xbf16, #tpu.memory_space<vmem>>, %arg3: memref<8x256xf32, #tpu.memory_space<vmem>>, %arg4: memref<16x128xbf16, #tpu.memory_space<vmem>>) attributes {dimension_semantics = [#tpu.dimension_semantics<parallel>], iteration_bounds = array<i64: 1>, scalar_prefetch = 0 : i64, scratch_operands = 0 : i64, tpu.core_type = #tpu.core_type<tc>, window_params = [{transform_indices = @transform_0, window_bounds = array<i64: 16, 32>}, {pipeline_mode = #tpu.pipeline_mode<synchronous>, transform_indices = @transform_1, window_bounds = array<i64: 784, 256>}, {pipeline_mode = #tpu.pipeline_mode<synchronous>, transform_indices = @transform_2, window_bounds = array<i64: 8, 256>}, {transform_indices = @transform_3, window_bounds = array<i64: 16, 128>}]} {
    %c0 = arith.constant 0 : index
    %c0_0 = arith.constant 0 : index
    %0 = vector.load %arg1[%c0, %c0_0] : memref<16x32xf32, #tpu.memory_space<vmem>>, vector<16x32xf32>
    %c0_1 = arith.constant 0 : index
    %c0_2 = arith.constant 0 : index
    %1 = vector.load %arg3[%c0_1, %c0_2] : memref<8x256xf32, #tpu.memory_space<vmem>>, vector<1x16xf32>
    %c1 = arith.constant 1 : index
    %c0_3 = arith.constant 0 : index
    %2 = vector.load %arg3[%c1, %c0_3] : memref<8x256xf32, #tpu.memory_space<vmem>>, vector<1x32xf32>
    %c2 = arith.constant 2 : index
    %c0_4 = arith.constant 0 : index
    %3 = vector.load %arg3[%c2, %c0_4] : memref<8x256xf32, #tpu.memory_space<vmem>>, vector<1x192xf32>
    %c3 = arith.constant 3 : index
    %c0_5 = arith.constant 0 : index
    %4 = vector.load %arg3[%c3, %c0_5] : memref<8x256xf32, #tpu.memory_space<vmem>>, vector<1x256xf32>
    %c4 = arith.constant 4 : index
    %c0_6 = arith.constant 0 : index
    %5 = vector.load %arg3[%c4, %c0_6] : memref<8x256xf32, #tpu.memory_space<vmem>>, vector<1x256xf32>
    %c5 = arith.constant 5 : index
    %c0_7 = arith.constant 0 : index
    %6 = vector.load %arg3[%c5, %c0_7] : memref<8x256xf32, #tpu.memory_space<vmem>>, vector<1x128xf32>
    %7 = vector.extract_strided_slice %0 {offsets = [0, 0], sizes = [16, 1], strides = [1, 1]} : vector<16x32xf32> to vector<16x1xf32>
    %8 = vector.broadcast %7 : vector<16x1xf32> to vector<16x16xf32>
    %9 = vector.broadcast %1 : vector<1x16xf32> to vector<16x16xf32>
    %10 = arith.mulf %8, %9 : vector<16x16xf32>
    %11 = tpu.iota {dimensions = array<i32: 1>} : vector<16x16xi32>
    %c8_i32 = arith.constant 8 : i32
    %12 = vector.broadcast %c8_i32 : i32 to vector<16x16xi32>
    %13 = arith.cmpi slt, %11, %12 : vector<16x16xi32>
    %14 = math.sin %10 : vector<16x16xf32>
    %15 = math.cos %10 : vector<16x16xf32>
    %16 = arith.select %13, %14, %15 : vector<16x16xi1>, vector<16x16xf32>
    %17 = arith.truncf %16 : vector<16x16xf32> to vector<16x16xbf16>
    %c0_8 = arith.constant 0 : index
    %c0_9 = arith.constant 0 : index
    %18 = vector.load %arg2[%c0_8, %c0_9] : memref<784x256xbf16, #tpu.memory_space<vmem>>, vector<16x32xbf16>
    %cst = arith.constant dense<0.000000e+00> : vector<16x32xf32>
    %19 = tpu.matmul %17, %18, %cst {dimension_numbers = #tpu.dot_dimension_numbers<[1], [0], [0], [1], [0, 0, 1, 1], [], []>} : vector<16x16xbf16>, vector<16x32xbf16>, vector<16x32xf32> -> vector<16x32xf32>
    %20 = vector.broadcast %2 : vector<1x32xf32> to vector<16x32xf32>
    %21 = arith.addf %19, %20 : vector<16x32xf32>
    %cst_10 = arith.constant 2.000000e+01 : f32
    %22 = vector.broadcast %cst_10 : f32 to vector<16x32xf32>
    %23 = arith.minimumf %21, %22 : vector<16x32xf32>
    %24 = math.exp %23 : vector<16x32xf32>
    %cst_11 = arith.constant 1.000000e+00 : f32
    %25 = vector.broadcast %cst_11 : f32 to vector<16x32xf32>
    %26 = arith.addf %25, %24 : vector<16x32xf32>
    %cst_12 = arith.constant 1.000000e+00 : f32
    %27 = vector.broadcast %cst_12 : f32 to vector<16x32xf32>
    %28 = arith.addf %27, %24 : vector<16x32xf32>
    %29 = arith.mulf %26, %28 : vector<16x32xf32>
    %cst_13 = arith.constant 1.000000e+00 : f32
    %30 = vector.broadcast %cst_13 : f32 to vector<16x32xf32>
    %31 = arith.subf %29, %30 : vector<16x32xf32>
    %32 = arith.mulf %21, %31 : vector<16x32xf32>
    %cst_14 = arith.constant 1.000000e+00 : f32
    %33 = vector.broadcast %cst_14 : f32 to vector<16x32xf32>
    %34 = arith.addf %29, %33 : vector<16x32xf32>
    %35 = tpu.reciprocal %34 {approx = true} : vector<16x32xf32> -> vector<16x32xf32>
    %36 = arith.mulf %32, %35 : vector<16x32xf32>
    %37 = arith.truncf %0 : vector<16x32xf32> to vector<16x32xbf16>
    %c48 = arith.constant 48 : index
    %c0_15 = arith.constant 0 : index
    %38 = vector.load %arg2[%c48, %c0_15] : memref<784x256xbf16, #tpu.memory_space<vmem>>, vector<32x192xbf16>
    %cst_16 = arith.constant dense<0.000000e+00> : vector<16x192xf32>
    %39 = tpu.matmul %37, %38, %cst_16 {dimension_numbers = #tpu.dot_dimension_numbers<[1], [0], [0], [1], [0, 0, 1, 1], [], []>} : vector<16x32xbf16>, vector<32x192xbf16>, vector<16x192xf32> -> vector<16x192xf32>
    %40 = vector.broadcast %3 : vector<1x192xf32> to vector<16x192xf32>
    %41 = arith.addf %39, %40 : vector<16x192xf32>
    %cst_17 = arith.constant 2.000000e+01 : f32
    %42 = vector.broadcast %cst_17 : f32 to vector<16x192xf32>
    %43 = arith.minimumf %41, %42 : vector<16x192xf32>
    %44 = math.exp %43 : vector<16x192xf32>
    %cst_18 = arith.constant 1.000000e+00 : f32
    %45 = vector.broadcast %cst_18 : f32 to vector<16x192xf32>
    %46 = arith.addf %45, %44 : vector<16x192xf32>
    %cst_19 = arith.constant 1.000000e+00 : f32
    %47 = vector.broadcast %cst_19 : f32 to vector<16x192xf32>
    %48 = arith.addf %47, %44 : vector<16x192xf32>
    %49 = arith.mulf %46, %48 : vector<16x192xf32>
    %cst_20 = arith.constant 1.000000e+00 : f32
    %50 = vector.broadcast %cst_20 : f32 to vector<16x192xf32>
    %51 = arith.subf %49, %50 : vector<16x192xf32>
    %52 = arith.mulf %41, %51 : vector<16x192xf32>
    %cst_21 = arith.constant 1.000000e+00 : f32
    %53 = vector.broadcast %cst_21 : f32 to vector<16x192xf32>
    %54 = arith.addf %49, %53 : vector<16x192xf32>
    %55 = tpu.reciprocal %54 {approx = true} : vector<16x192xf32> -> vector<16x192xf32>
    %56 = arith.mulf %52, %55 : vector<16x192xf32>
    %57 = arith.truncf %56 : vector<16x192xf32> to vector<16x192xbf16>
    %c80 = arith.constant 80 : index
    %c0_22 = arith.constant 0 : index
    %58 = vector.load %arg2[%c80, %c0_22] : memref<784x256xbf16, #tpu.memory_space<vmem>>, vector<192x256xbf16>
    %cst_23 = arith.constant dense<0.000000e+00> : vector<16x256xf32>
    %59 = tpu.matmul %57, %58, %cst_23 {dimension_numbers = #tpu.dot_dimension_numbers<[1], [0], [0], [1], [0, 0, 1, 1], [], []>} : vector<16x192xbf16>, vector<192x256xbf16>, vector<16x256xf32> -> vector<16x256xf32>
    %60 = arith.truncf %36 : vector<16x32xf32> to vector<16x32xbf16>
    %c16 = arith.constant 16 : index
    %c0_24 = arith.constant 0 : index
    %61 = vector.load %arg2[%c16, %c0_24] : memref<784x256xbf16, #tpu.memory_space<vmem>>, vector<32x256xbf16>
    %cst_25 = arith.constant dense<0.000000e+00> : vector<16x256xf32>
    %62 = tpu.matmul %60, %61, %cst_25 {dimension_numbers = #tpu.dot_dimension_numbers<[1], [0], [0], [1], [0, 0, 1, 1], [], []>} : vector<16x32xbf16>, vector<32x256xbf16>, vector<16x256xf32> -> vector<16x256xf32>
    %63 = arith.addf %59, %62 : vector<16x256xf32>
    %64 = vector.broadcast %4 : vector<1x256xf32> to vector<16x256xf32>
    %65 = arith.addf %63, %64 : vector<16x256xf32>
    %cst_26 = arith.constant 2.000000e+01 : f32
    %66 = vector.broadcast %cst_26 : f32 to vector<16x256xf32>
    %67 = arith.minimumf %65, %66 : vector<16x256xf32>
    %68 = math.exp %67 : vector<16x256xf32>
    %cst_27 = arith.constant 1.000000e+00 : f32
    %69 = vector.broadcast %cst_27 : f32 to vector<16x256xf32>
    %70 = arith.addf %69, %68 : vector<16x256xf32>
    %cst_28 = arith.constant 1.000000e+00 : f32
    %71 = vector.broadcast %cst_28 : f32 to vector<16x256xf32>
    %72 = arith.addf %71, %68 : vector<16x256xf32>
    %73 = arith.mulf %70, %72 : vector<16x256xf32>
    %cst_29 = arith.constant 1.000000e+00 : f32
    %74 = vector.broadcast %cst_29 : f32 to vector<16x256xf32>
    %75 = arith.subf %73, %74 : vector<16x256xf32>
    %76 = arith.mulf %65, %75 : vector<16x256xf32>
    %cst_30 = arith.constant 1.000000e+00 : f32
    %77 = vector.broadcast %cst_30 : f32 to vector<16x256xf32>
    %78 = arith.addf %73, %77 : vector<16x256xf32>
    %79 = tpu.reciprocal %78 {approx = true} : vector<16x256xf32> -> vector<16x256xf32>
    %80 = arith.mulf %76, %79 : vector<16x256xf32>
    %81 = arith.truncf %80 : vector<16x256xf32> to vector<16x256xbf16>
    %c272 = arith.constant 272 : index
    %c0_31 = arith.constant 0 : index
    %82 = vector.load %arg2[%c272, %c0_31] : memref<784x256xbf16, #tpu.memory_space<vmem>>, vector<256x256xbf16>
    %cst_32 = arith.constant dense<0.000000e+00> : vector<16x256xf32>
    %83 = tpu.matmul %81, %82, %cst_32 {dimension_numbers = #tpu.dot_dimension_numbers<[1], [0], [0], [1], [0, 0, 1, 1], [], []>} : vector<16x256xbf16>, vector<256x256xbf16>, vector<16x256xf32> -> vector<16x256xf32>
    %84 = vector.broadcast %5 : vector<1x256xf32> to vector<16x256xf32>
    %85 = arith.addf %83, %84 : vector<16x256xf32>
    %cst_33 = arith.constant 2.000000e+01 : f32
    %86 = vector.broadcast %cst_33 : f32 to vector<16x256xf32>
    %87 = arith.minimumf %85, %86 : vector<16x256xf32>
    %88 = math.exp %87 : vector<16x256xf32>
    %cst_34 = arith.constant 1.000000e+00 : f32
    %89 = vector.broadcast %cst_34 : f32 to vector<16x256xf32>
    %90 = arith.addf %89, %88 : vector<16x256xf32>
    %cst_35 = arith.constant 1.000000e+00 : f32
    %91 = vector.broadcast %cst_35 : f32 to vector<16x256xf32>
    %92 = arith.addf %91, %88 : vector<16x256xf32>
    %93 = arith.mulf %90, %92 : vector<16x256xf32>
    %cst_36 = arith.constant 1.000000e+00 : f32
    %94 = vector.broadcast %cst_36 : f32 to vector<16x256xf32>
    %95 = arith.subf %93, %94 : vector<16x256xf32>
    %96 = arith.mulf %85, %95 : vector<16x256xf32>
    %cst_37 = arith.constant 1.000000e+00 : f32
    %97 = vector.broadcast %cst_37 : f32 to vector<16x256xf32>
    %98 = arith.addf %93, %97 : vector<16x256xf32>
    %99 = tpu.reciprocal %98 {approx = true} : vector<16x256xf32> -> vector<16x256xf32>
    %100 = arith.mulf %96, %99 : vector<16x256xf32>
    %101 = arith.truncf %100 : vector<16x256xf32> to vector<16x256xbf16>
    %c528 = arith.constant 528 : index
    %c0_38 = arith.constant 0 : index
    %102 = vector.load %arg2[%c528, %c0_38] : memref<784x256xbf16, #tpu.memory_space<vmem>>, vector<256x128xbf16>
    %cst_39 = arith.constant dense<0.000000e+00> : vector<16x128xf32>
    %103 = tpu.matmul %101, %102, %cst_39 {dimension_numbers = #tpu.dot_dimension_numbers<[1], [0], [0], [1], [0, 0, 1, 1], [], []>} : vector<16x256xbf16>, vector<256x128xbf16>, vector<16x128xf32> -> vector<16x128xf32>
    %104 = vector.broadcast %6 : vector<1x128xf32> to vector<16x128xf32>
    %105 = arith.addf %103, %104 : vector<16x128xf32>
    %106 = math.tanh %105 : vector<16x128xf32>
    %107 = arith.truncf %106 : vector<16x128xf32> to vector<16x128xbf16>
    %c0_40 = arith.constant 0 : index
    %c0_41 = arith.constant 0 : index
    %108 = vector.load %arg4[%c0_40, %c0_41] : memref<16x128xbf16, #tpu.memory_space<vmem>>, vector<16x128xbf16>
    tpu.vector_store %arg4[%c0_40, %c0_41], %107 {strides = array<i32>} : memref<16x128xbf16, #tpu.memory_space<vmem>>, vector<16x128xbf16>,
    return
  }
  func.func @transform_0(%arg0: i32) -> (i32, i32) {
    %c0_i32 = arith.constant 0 : i32
    %c0_i32_0 = arith.constant 0 : i32
    return %arg0, %c0_i32 : i32, i32
  }
  func.func @transform_1(%arg0: i32) -> (i32, i32) {
    %c0_i32 = arith.constant 0 : i32
    %c0_i32_0 = arith.constant 0 : i32
    %c0_i32_1 = arith.constant 0 : i32
    return %c0_i32, %c0_i32_0 : i32, i32
  }
  func.func @transform_2(%arg0: i32) -> (i32, i32) {
    %c0_i32 = arith.constant 0 : i32
    %c0_i32_0 = arith.constant 0 : i32
    %c0_i32_1 = arith.constant 0 : i32
    return %c0_i32, %c0_i32_0 : i32, i32
  }
  func.func @transform_3(%arg0: i32) -> (i32, i32) {
    %c0_i32 = arith.constant 0 : i32
    %c0_i32_0 = arith.constant 0 : i32
    return %arg0, %c0_i32 : i32, i32
  }
}

</mosaic_0001>

<bundles_post_ra>
// kernel: diffusion_net_forward.1
= control target key start
LH: loop header
LB: loop body
LE: loop exit
PB: predicated region body
PF: predicated region fallthrough
CT: control target
= control target key end

     0   :  { %8 = vsyncpa [#allocation3], 0  ;;  %s1850_s12 = smov [#allocation2]   ;;  %s2001_s0 = inlined_call_operand.vmem [shape: f32[16,32], index: 0, kind: input, shape index: {}]   ;;  %s2002_s1 = inlined_call_operand.hbm [shape: bf16[784,256], index: 1, kind: input, shape index: {}]   ;;  %s2003_s2 = inlined_call_operand.vmem [shape: f32[8,256], index: 2, kind: input, shape index: {}]   ;;  %s2004_s3 = inlined_call_operand.vmem [shape: bf16[16,128], index: 3, kind: output, shape index: {}]  }
   0x1   :  { %s16_s13 = sshll.u32 %s1850_s12, 4  ;;  %s1826_s16 = scalar_lea.hbm %s2002_s1, 12544  ;;  %s17_s13 = int_to_ptr.vmem [resolvable:$true] %s16_s13 }
   0x2   :  { %p1827_p0 = scmp.ne.s32.totalorder %s2002_s1, %s1826_s16  ;;  %p1830_p1 = scmp.lt.u32.totalorder %s1826_s16, %s2002_s1 }
   0x4   :  { %p1832_p2 = pnand %p1830_p1, %p1827_p0 }
   0x6   :  { %1835 = shalt.err (!%p1832_p2)
}
   0x7   :  { %s1836_s21 = scalar_lea.vmem %s17_s13, 12544  ;;  %p1841_p4 = scmp.lt.s32.totalorder %s17_s13, %s17_s13 }
   0x8   :  { %p1837_p3 = scmp.ne.s32.totalorder %s17_s13, %s1836_s21  ;;  %p1842_p5 = scmp.lt.s32.totalorder %s1836_s21, %s1836_s21 }
   0xa   :  { %p1843_p6 = por %p1842_p5, %p1841_p4 }
   0xc   :  { %p1844_p7 = pnand %p1843_p6, %p1837_p3 }
   0xe   :  { %1847 = shalt.err (!%p1844_p7)
}
   0xf   :  { %s1851_s22 = smov 128   ;;  %s1852_s23 = smov 8  }
  0x10   :  { %22 = dma.hbm_to_vmem [thread:$0]  %s2002_s1, 12544, %s17_s13, [#allocation3], %s1851_s22, %s1851_s22, %s1852_s23  }
  0x11   :  { %1848 = dma.done.wait [#allocation3], 12544  }
  0x12   :  { %1849 = vsyncadd [#allocation3], 4294954752  ;;  %v1853_v0 = vmov 0   ;;  %v29_v1 = vld [vmem:[%s2001_s0] sm:$0xff]  ;;  %v30_v2 = vld [vmem:[%s2001_s0 + $0x8] sm:$0xff]  ;;  %vm581_vm0 = vcmask 261120  }
  0x13   :  { %1644 = vset.pattern.permute.xlu0 %v1853_v0  ;;  %617 = vmatprep.mubr.bf16.mxu1 %v1853_v0  ;;  %v1645_v3 = vld [vmem:[#allocation2 + $0x34] ss:$8 sps:$4 sm:$0xff]   ;;  %v1647_v4 = vld [vmem:[#allocation2 + $0x30] ss:$8 sps:$4 sm:$0xff]   ;;  %v1648_v5 = vld [vmem:[#allocation2 + $0x44] ss:$8 sps:$4 sm:$0xff]   ;;  %v545_v7 = vpack.c.bf16 %v30_v2, %v29_v1 }
  0x14   :  { %42 = vperm.xlu0 %1644, %v29_v1   ;;  %585 = vmatprep.subr.bf16.mxu1 %v1645_v3  ;;  %v1650_v6 = vld [vmem:[#allocation2 + $0x40] ss:$8 sps:$4 sm:$0xff]   ;;  %v1854_v9 = vmov 0.0   ;;  %vm1855_vm1 = vmmov 0   ;;  %v1654_v10 = vld [vmem:[#allocation2 + $0x54] ss:$8 sps:$4 sm:$0xff]  }
  0x15   :  { %586 = vmatpush1.bf16.msra.mxu1 %v1647_v4  ;;  %v1651_v8 = vld [vmem:[#allocation2] ss:$8 sps:$4 sm:$0xff]   ;;  %1614 = vmatprep.subr.bf16.mxu0 %v1854_v9  ;;  %v1856_v32 = vmov 683565275   ;;  %v1857_v36 = vmov 2475754826  }
  0x16   :  { %587 = vmatprep.subr.bf16.mxu1 %v1648_v5  ;;  %1616 = vmatprep.mubr.msk.bf16.mxu0 %vm1855_vm1, %v1854_v9  ;;  %v31_v11 = vld [vmem:[%s2003_s2] ss:$0 sm:$0xff]  ;;  %v1858_v38 = vmov 2131351028   ;;  %v1859_v40 = vmov 2102212464  }
  0x17   :  { %1615 = vmatpush3.bf16.msra.mxu0 %v1651_v8  ;;  %v1860_v42 = vmov 920167782   ;;  %v1861_v49 = vmov 1326507024  }
  0x18   :  { %47 = vperm.xlu0 %1644, %v30_v2   ;;  %889 = vmatprep.subr.bf16.mxu0 %v1654_v10 }
  0x19   :  { %588 = vmatpush1.bf16.msra.mxu1 %v1650_v6 }
  0x1c   :  { %1490 = vmatmul.mubr.msk.bf16.vlgmr.msra.gmra.mrb[0].mxu1 %vm581_vm0, %v545_v7 }
  0x1d   :  { %754 = vmatprep.mubr.bf16.mxu1 %v1853_v0 }
  0x93   :  { %v43_v12 = vpop.permute.xlu0 %42 }
  0x94   :  { %v1904_v13 = vmul.f32 %v43_v12, %v31_v11 }
  0x96   :  { %v55_v14 = vand.u32 2147483647, %v1904_v13  ;;  %v58_v15 = vand.u32 2139095040, %v1904_v13  ;;  %vm57_vm1 = vcmp.lt.s32.totalorder %v1904_v13, 0 }
  0x97   :  { %v48_v16 = vpop.permute.xlu0 %47 }
  0x98   :  { %v59_v17 = vshrl.u32 %v58_v15, 23  ;;  %v1908_v18 = vmul.f32 %v48_v16, %v31_v11  ;;  %v62_v19 = vand.u32 8388607, %v55_v14 }
  0x9a   :  { %v1466_v20 = vadd.s32 4294967169, %v59_v17  ;;  %v162_v21 = vand.u32 2139095040, %v1908_v18  ;;  %v63_v23 = vor.u32 8388608, %v62_v19  ;;  %v159_v25 = vand.u32 2147483647, %v1908_v18 }
  0x9c   :  { %v65_v22 = vadd.s32 1, %v1466_v20  ;;  %v163_v24 = vshrl.u32 %v162_v21, 23  ;;  %v1914_v30 = vshll.u32 %v63_v23, 8  ;;  %v166_v34 = vand.u32 8388607, %v159_v25 }
  0x9e   :  { %vm66_vm2 = vcmp.gt.s32.totalorder %v65_v22, 0  ;;  %v1470_v27 = vadd.s32 4294967169, %v163_v24  ;;  %v167_v0 = vor.u32 8388608, %v166_v34 }
  0x9f   :  { %v67_v26 = vsel %vm66_vm2, %v65_v22, 0  ;;  %vm56_vm2 = vcmp.le.f32.partialorder %v55_v14, 0.7853982 }
  0xa0   :  { %v68_v28 = vshrl.u32 %v67_v26, 5  ;;  %v69_v29 = vand.u32 31, %v67_v26  ;;  %v169_v35 = vadd.s32 1, %v1470_v27  ;;  %v207_v15 = vshll.u32 %v167_v0, 8 }
  0xa2   :  { %v70_v31 = vsub.s32 32, %v69_v29  ;;  %v72_v33 = vshll.u32 %v1856_v32, %v69_v29  ;;  %v75_v37 = vshll.u32 %v1857_v36, %v69_v29  ;;  %v78_v39 = vshll.u32 %v1858_v38, %v69_v29 }
  0xa3   :  { %v81_v41 = vshll.u32 %v1859_v40, %v69_v29  ;;  %v84_v43 = vshll.u32 %v1860_v42, %v69_v29  ;;  %vm87_vm3 = vcmp.lt.s32.totalorder %v68_v28, 1  ;;  %vm89_vm4 = vcmp.lt.s32.totalorder %v68_v28, 3 }
  0xa4   :  { %v73_v44 = vshrl.u32 %v1857_v36, %v70_v31  ;;  %v76_v45 = vshrl.u32 %v1858_v38, %v70_v31  ;;  %v79_v46 = vshrl.u32 %v1859_v40, %v70_v31  ;;  %v71_v47 = vshrl.u32 %v1856_v32, %v70_v31 }
  0xa5   :  { %v82_v48 = vshrl.u32 %v1860_v42, %v70_v31  ;;  %v85_v50 = vshrl.u32 %v1861_v49, %v70_v31  ;;  %vm170_vm5 = vcmp.gt.s32.totalorder %v169_v35, 0  ;;  %vm90_vm6 = vcmp.lt.s32.totalorder %v68_v28, 4 }
  0xa6   :  { %v74_v51 = vor.u32 %v73_v44, %v72_v33  ;;  %v77_v52 = vor.u32 %v76_v45, %v75_v37  ;;  %v80_v53 = vor.u32 %v79_v46, %v78_v39  ;;  %v171_v56 = vsel %vm170_vm5, %v169_v35, 0 }
  0xa7   :  { %v83_v54 = vor.u32 %v82_v48, %v81_v41  ;;  %v86_v55 = vor.u32 %v85_v50, %v84_v43  ;;  %vm88_vm7 = vcmp.lt.s32.totalorder %v68_v28, 2  ;;  %v173_v3 = vand.u32 31, %v171_v56 }
  0xa8   :  { %v91_v57 = vsel %vm87_vm3, %v71_v47, %v74_v51  ;;  %v92_v58 = vsel %vm90_vm6, %v80_v53, 2102212464  ;;  %v95_v59 = vsel %vm87_vm3, %v74_v51, %v77_v52  ;;  %v99_v60 = vsel %vm87_vm3, %v77_v52, %v80_v53 }
  0xa9   :  { %v93_v61 = vsel %vm89_vm4, %v77_v52, %v92_v58  ;;  %v96_v62 = vsel %vm90_vm6, %v83_v54, 920167782  ;;  %v100_v63 = vsel %vm90_vm6, %v86_v55, 1326507024  ;;  %v172_v11 = vshrl.u32 %v171_v56, 5 }
  0xaa   :  { %v97_v1 = vsel %vm89_vm4, %v80_v53, %v96_v62  ;;  %v101_v2 = vsel %vm89_vm4, %v83_v54, %v100_v63  ;;  %v94_v4 = vsel %vm88_vm7, %v91_v57, %v93_v61  ;;  %v174_v12 = vsub.s32 32, %v173_v3 }
  0xab   :  { %v98_v5 = vsel %vm88_vm7, %v95_v59, %v97_v1  ;;  %v102_v6 = vsel %vm88_vm7, %v99_v60, %v101_v2  ;;  %v110_v16 = vmul.u32 %v1914_v30, %v94_v4  ;;  %v176_v17 = vshll.u32 %v1856_v32, %v173_v3 }
  0xac   :  { %v1927_v7 = vmul.u32.u64.low %v1914_v30, %v102_v6  ;;  %v1928_v8 = vmul.u32.u64.high %v1914_v30, %v102_v6, %v1927_v7  ;;  %v1931_v9 = vmul.u32.u64.low %v1914_v30, %v98_v5  ;;  %v1932_v10 = vmul.u32.u64.high %v1914_v30, %v98_v5, %v1931_v9 }
  0xad   :  { %v179_v19 = vshll.u32 %v1857_v36, %v173_v3  ;;  %v182_v20 = vshll.u32 %v1858_v38, %v173_v3  ;;  %v177_v21 = vshrl.u32 %v1857_v36, %v174_v12  ;;  %v180_v22 = vshrl.u32 %v1858_v38, %v174_v12 }
  0xae   :  { %v183_v23 = vshrl.u32 %v1859_v40, %v174_v12  ;;  %v185_v24 = vshll.u32 %v1859_v40, %v173_v3  ;;  %vm112_vm8 = vc.u32 %v1928_v8, %v1931_v9  ;;  %v113_v26 = vadd.s32 1, %v1932_v10 }
  0xaf   :  { %v186_v27 = vshrl.u32 %v1860_v42, %v174_v12  ;;  %v188_v28 = vshll.u32 %v1860_v42, %v173_v3  ;;  %v178_v29 = vor.u32 %v177_v21, %v176_v17  ;;  %v181_v31 = vor.u32 %v180_v22, %v179_v19 }
  0xb0   :  { %v184_v33 = vor.u32 %v183_v23, %v182_v20  ;;  %v189_v34 = vshrl.u32 %v1861_v49, %v174_v12  ;;  %v114_v30 = vsel %vm112_vm8, %v113_v26, %v1932_v10  ;;  %vm191_vm9 = vcmp.lt.s32.totalorder %v172_v11, 1 }
  0xb1   :  { %v187_v35 = vor.u32 %v186_v27, %v185_v24  ;;  %vm194_vm10 = vcmp.lt.s32.totalorder %v172_v11, 4  ;;  %v115_v36 = vadd.s32 %v114_v30, %v110_v16  ;;  %vm193_vm11 = vcmp.lt.s32.totalorder %v172_v11, 3 }
  0xb2   :  { %v190_v37 = vor.u32 %v189_v34, %v188_v28  ;;  %v196_v38 = vsel %vm194_vm10, %v184_v33, 2102212464  ;;  %v175_v39 = vshrl.u32 %v1856_v32, %v174_v12  ;;  %v199_v40 = vsel %vm191_vm9, %v178_v29, %v181_v31 }
  0xb3   :  { %v200_v41 = vsel %vm194_vm10, %v187_v35, 920167782  ;;  %v203_v43 = vsel %vm191_vm9, %v181_v31, %v184_v33  ;;  %v116_v44 = vadd.s32 536870912, %v115_v36  ;;  %vm192_vm12 = vcmp.lt.s32.totalorder %v172_v11, 2 }
  0xb4   :  { %v201_v42 = vsel %vm193_vm11, %v184_v33, %v200_v41  ;;  %v204_v45 = vsel %vm194_vm10, %v190_v37, 1326507024  ;;  %v195_v46 = vsel %vm191_vm9, %v175_v39, %v178_v29  ;;  %v197_v47 = vsel %vm193_vm11, %v181_v31, %v196_v38 }
  0xb5   :  { %v202_v48 = vsel %vm192_vm12, %v199_v40, %v201_v42  ;;  %v205_v49 = vsel %vm193_vm11, %v187_v35, %v204_v45  ;;  %v117_v50 = vshrl.u32 %v116_v44, 30  ;;  %v198_v56 = vsel %vm192_vm12, %v195_v46, %v197_v47 }
  0xb6   :  { %v206_v51 = vsel %vm192_vm12, %v203_v43, %v205_v49  ;;  %v1942_v52 = vmul.u32.u64.low %v207_v15, %v202_v48  ;;  %v1943_v53 = vmul.u32.u64.high %v207_v15, %v202_v48, %v1942_v52  ;;  %v214_v59 = vmul.u32 %v207_v15, %v198_v56 }
  0xb7   :  { %v1945_v54 = vmul.u32.u64.low %v207_v15, %v206_v51  ;;  %v1946_v55 = vmul.u32.u64.high %v207_v15, %v206_v51, %v1945_v54  ;;  %v118_v32 = vshll.u32 %v117_v50, 30  ;;  %v111_v7 = vadd.s32 %v1931_v9, %v1928_v8 }
  0xb8   :  { %v217_v58 = vadd.s32 1, %v1943_v53  ;;  %v141_v40 = vsub.s32 4, %v117_v50  ;;  %vm161_vm3 = vcmp.lt.s32.totalorder %v1908_v18, 0  ;;  %vm160_vm4 = vcmp.le.f32.partialorder %v159_v25, 0.7853982 }
  0xb9   :  { %v119_v57 = vsub.s32 %v115_v36, %v118_v32  ;;  %vm216_vm13 = vc.u32 %v1946_v55, %v1942_v52  ;;  %v215_v31 = vadd.s32 %v1942_v52, %v1946_v55  ;;  %v52_v32 = vlaneseq }
  0xba   :  { %v218_v61 = vsel %vm216_vm13, %v217_v58, %v1943_v53  ;;  %v142_v42 = vsel %vm57_vm1, %v141_v40, %v117_v50  ;;  %vm147_vm10 = vweird.f32 %v1904_v13  ;;  %v1676_v40 = vld [vmem:[#allocation2 + $0xd0] ss:$8 sps:$4 sm:$0xff]  }
  0xbb   :  { %v121_v60 = vsub.s32 0, %v119_v57  ;;  %v219_v62 = vadd.s32 %v218_v61, %v214_v59  ;;  %v144_v47 = vsel %vm56_vm2, 0, %v142_v42  ;;  %v552_v42 = vshrl.u32 %v52_v32, 7 }
  0xbc   :  { %v148_v51 = vadd.s32 3, %v144_v47  ;;  %v356_v50 = vand.u32 3, %v144_v47  ;;  %v1463_v47 = vld [vmem:[%s2003_s2 + $0x2] ss:$8 sm:$0x3] }
  0xbd   :  { %v1467_v63 = vmin.u32 %v121_v60, %v119_v57  ;;  %v220_v0 = vadd.s32 536870912, %v219_v62  ;;  %v53_v60 = vand.u32 127, %v52_v32 }
  0xbe   :  { %v149_v56 = vand.u32 3, %v148_v51  ;;  %vm358_vm5 = vcmp.eq.s32.totalorder %v356_v50, 0  ;;  %vm361_vm6 = vcmp.eq.s32.totalorder %v356_v50, 2  ;;  %vm357_vm12 = vcmp.lt.s32.totalorder %v356_v50, 2 }
  0xbf   :  { %v123_v1 = vclz %v1467_v63  ;;  %v221_v2 = vshrl.u32 %v220_v0, 30  ;;  %vm54_vm9 = vcmp.lt.s32.totalorder %v53_v60, 8 }
  0xc0   :  { %vm151_vm7 = vcmp.eq.s32.totalorder %v149_v56, 0  ;;  %vm154_vm8 = vcmp.eq.s32.totalorder %v149_v56, 2  ;;  %vm150_vm11 = vcmp.lt.s32.totalorder %v149_v56, 2 }
  0xc1   :  { %v1468_v3 = vadd.s32 4294967294, %v123_v1  ;;  %v222_v4 = vshll.u32 %v221_v2, 30  ;;  %v245_v45 = vsub.s32 4, %v221_v2 }
  0xc3   :  { %vm1469_vm14 = vcmp.lt.s32.totalorder %v1468_v3, 0  ;;  %v223_v6 = vsub.s32 %v219_v62, %v222_v4  ;;  %v246_v49 = vsel %vm161_vm3, %v245_v45, %v221_v2  ;;  %v1682_v45 = vld [vmem:[#allocation2 + $0xf0] ss:$8 sps:$4 sm:$0xff]  }
  0xc4   :  { %v126_v5 = vsel %vm1469_vm14, 0, %v1468_v3  ;;  %v248_v54 = vsel %vm160_vm4, 0, %v246_v49 }
  0xc5   :  { %v127_v10 = vsub.s32 32, %v126_v5  ;;  %v131_v11 = vsub.s32 4294967266, %v126_v5  ;;  %v225_v12 = vsub.s32 0, %v223_v6  ;;  %v128_v15 = vshll.u32 %v119_v57, %v126_v5 }
  0xc6   :  { %v252_v57 = vadd.s32 3, %v248_v54  ;;  %v459_v61 = vand.u32 3, %v248_v54 }
  0xc7   :  { %v129_v16 = vshrl.u32 %v111_v7, %v127_v10  ;;  %v132_v17 = vadd.s32 127, %v131_v11  ;;  %v1471_v19 = vmin.u32 %v225_v12, %v223_v6 }
  0xc8   :  { %v253_v25 = vand.u32 3, %v252_v57  ;;  %vm460_vm13 = vcmp.lt.s32.totalorder %v459_v61, 2 }
  0xc9   :  { %v130_v20 = vor.u32 %v129_v16, %v128_v15  ;;  %v133_v21 = vshll.u32 %v132_v17, 23  ;;  %v227_v22 = vclz %v1471_v19 }
  0xca   :  { %vm258_vm14 = vcmp.eq.s32.totalorder %v253_v25, 2 }
  0xcb   :  { %v134_v23 = vor.u32 4788187, %v133_v21  ;;  %v1472_v24 = vadd.s32 4294967294, %v227_v22  ;;  %v137_v27 = vcvt.s32.f32 %v130_v20 }
  0xcd   :  { %v135_v26 = vand.u32 2147483647, %v134_v23  ;;  %vm1473_vm15 = vcmp.lt.s32.totalorder %v1472_v24, 0 }
  0xce   :  { %v230_v29 = vsel %vm1473_vm15, 0, %v1472_v24  ;;  %vm461_vm15 = vcmp.eq.s32.totalorder %v459_v61, 0 }
  0xcf   :  { %v138_v28 = vmul.f32 %v137_v27, %v135_v26  ;;  %v231_v8 = vsub.s32 32, %v230_v29  ;;  %v235_v9 = vsub.s32 4294967266, %v230_v29  ;;  %v232_v34 = vshll.u32 %v223_v6, %v230_v29  ;;  %v1652_v26 = vld [vmem:[#allocation2 + $0x50] ss:$8 sps:$4 sm:$0xff]   ;;  %v1655_v29 = vld [vmem:[#allocation2 + $0x60] ss:$8 sps:$4 sm:$0xff]  }
  0xd1   :  { %v139_v33 = vxor.u32 2147483648, %v138_v28  ;;  %v233_v30 = vshrl.u32 %v215_v31, %v231_v8  ;;  %v236_v35 = vadd.s32 127, %v235_v9  ;;  %v1658_v31 = vld [vmem:[#allocation2 + $0x70] ss:$8 sps:$4 sm:$0xff]   ;;  %v1661_v8 = vld [vmem:[#allocation2 + $0x80] ss:$8 sps:$4 sm:$0xff]  }
  0xd2   :  { %v1666_v9 = vld [vmem:[#allocation2 + $0x94] ss:$8 sps:$4 sm:$0xff]  }
  0xd3   :  { %v140_v36 = vsel %vm57_vm1, %v139_v33, %v138_v28  ;;  %v234_v38 = vor.u32 %v233_v30, %v232_v34  ;;  %v237_v39 = vshll.u32 %v236_v35, 23  ;;  %vm464_vm1 = vcmp.eq.s32.totalorder %v459_v61, 2  ;;  %v1657_v28 = vld [vmem:[#allocation2 + $0x64] ss:$8 sps:$4 sm:$0xff]   ;;  %v1664_v33 = vld [vmem:[#allocation2 + $0x90] ss:$8 sps:$4 sm:$0xff]  }
  0xd4   :  { %v143_v37 = vsel %vm56_vm2, %v1904_v13, %v140_v36  ;;  %vm254_vm2 = vcmp.lt.s32.totalorder %v253_v25, 2  ;;  %v1660_v13 = vld [vmem:[#allocation2 + $0x74] ss:$8 sps:$4 sm:$0xff]   ;;  %v1669_v34 = vld [vmem:[#allocation2 + $0xa4] ss:$8 sps:$4 sm:$0xff]  }
  0xd5   :  { %1758 = vcosq.f32 %v143_v37  ;;  %v238_v41 = vor.u32 4788187, %v237_v39  ;;  %v241_v44 = vcvt.s32.f32 %v234_v38  ;;  %v1667_v30 = vld [vmem:[#allocation2 + $0xa0] ss:$8 sps:$4 sm:$0xff]   ;;  %v1672_v35 = vld [vmem:[#allocation2 + $0xb4] ss:$8 sps:$4 sm:$0xff]  }
  0xd6   :  { %1760 = vsinq.f32 %v143_v37  ;;  %v1670_v36 = vld [vmem:[#allocation2 + $0xb0] ss:$8 sps:$4 sm:$0xff]   ;;  %v1675_v37 = vld [vmem:[#allocation2 + $0xc4] ss:$8 sps:$4 sm:$0xff]   ;;  %v1673_v38 = vld [vmem:[#allocation2 + $0xc0] ss:$8 sps:$4 sm:$0xff]  }
  0xd7   :  { %v239_v43 = vand.u32 2147483647, %v238_v41  ;;  %v1678_v39 = vld [vmem:[#allocation2 + $0xd4] ss:$8 sps:$4 sm:$0xff]   ;;  %v1681_v41 = vld [vmem:[#allocation2 + $0xe4] ss:$8 sps:$4 sm:$0xff]  }
  0xd9   :  { %v242_v46 = vmul.f32 %v241_v44, %v239_v43  ;;  %v1679_v43 = vld [vmem:[#allocation2 + $0xe0] ss:$8 sps:$4 sm:$0xff]   ;;  %v1684_v44 = vld [vmem:[#allocation2 + $0xf4] ss:$8 sps:$4 sm:$0xff]  }
  0xdb   :  { %v243_v48 = vxor.u32 2147483648, %v242_v46 }
  0xdd   :  { %v244_v14 = vsel %vm161_vm3, %v243_v48, %v242_v46  ;;  %vm255_vm3 = vcmp.eq.s32.totalorder %v253_v25, 0  ;;  %v1972_v46 = vsub.s32 0, %v552_v42  ;;  %v1977_v48 = vsub.s32 1, %v552_v42  ;;  %v32_v42 = vld [vmem:[%s2003_s2 + $0x1] ss:$0 sm:$0xff] }
  0xde   :  { %v247_v52 = vsel %vm160_vm4, %v1908_v18, %v244_v14  ;;  %vm251_vm4 = vweird.f32 %v1908_v18  ;;  %v1663_v18 = vld [vmem:[#allocation2 + $0x84] ss:$8 sps:$4 sm:$0xff]  }
  0xdf   :  { %v1759_v53 = vpop.eup %1758  ;;  %1762 = vcosq.f32 %v247_v52  ;;  %v554_v49 = vrot.slane %v1463_v47, %v1972_v46  ;;  %v558_v14 = vrot.slane %v1463_v47, %v1977_v48 }
  0xe0   :  { %v1761_v55 = vpop.eup %1760  ;;  %1764 = vsinq.f32 %v247_v52  ;;  %v155_v59 = vxor.u32 2147483648, %v1759_v53 }
  0xe1   :  { %v152_v58 = vxor.u32 2147483648, %v1761_v55 }
  0xe2   :  { %v156_v63 = vsel %vm154_vm8, %v155_v59, %v1761_v55  ;;  %v363_v1 = vsel %vm361_vm6, %v155_v59, %v1761_v55  ;;  %vm885_vm6 = vcmask 523264  }
  0xe3   :  { %v153_v62 = vsel %vm151_vm7, %v1759_v53, %v152_v58  ;;  %v360_v0 = vsel %vm358_vm5, %v1759_v53, %v152_v58  ;;  %vm480_vm5 = vcmask 130048  }
  0xe4   :  { %v157_v4 = vsel %vm150_vm11, %v153_v62, %v156_v63  ;;  %v364_v6 = vsel %vm357_vm12, %v360_v0, %v363_v1 }
  0xe5   :  { %v158_v12 = vsel %vm147_vm10, nan, %v157_v4  ;;  %v365_v16 = vsel %vm147_vm10, nan, %v364_v6 }
  0xe6   :  { %v469_v23 = vsel %vm54_vm9, %v158_v12, %v365_v16 }
  0xe9   :  { %v1763_v2 = vpop.eup %1762 }
  0xea   :  { %v1765_v3 = vpop.eup %1764  ;;  %v259_v5 = vxor.u32 2147483648, %v1763_v2 }
  0xeb   :  { %v256_v7 = vxor.u32 2147483648, %v1765_v3 }
  0xec   :  { %v260_v10 = vsel %vm258_vm14, %v259_v5, %v1765_v3  ;;  %v466_v11 = vsel %vm464_vm1, %v259_v5, %v1765_v3 }
  0xed   :  { %v257_v15 = vsel %vm255_vm3, %v1763_v2, %v256_v7  ;;  %v463_v17 = vsel %vm461_vm15, %v1763_v2, %v256_v7 }
  0xee   :  { %v261_v19 = vsel %vm254_vm2, %v257_v15, %v260_v10  ;;  %v467_v20 = vsel %vm460_vm13, %v463_v17, %v466_v11 }
  0xef   :  { %v262_v21 = vsel %vm251_vm4, nan, %v261_v19  ;;  %v468_v22 = vsel %vm251_vm4, nan, %v467_v20  ;;  %v619_v51 = vpop.f32.mrb[0].mxu1 }
  0xf0   :  { %v470_v24 = vsel %vm54_vm9, %v262_v21, %v468_v22  ;;  %v620_v52 = vadd.f32 %v619_v51, %v554_v49  ;;  %v621_v53 = vpop.f32.mrb[1].mxu1 }
  0xf1   :  { %v471_v27 = vpack.c.bf16 %v470_v24, %v469_v23  ;;  %v622_v54 = vadd.f32 %v621_v53, %v558_v14  ;;  %v623_v55 = vpop.f32.mrb[2].mxu1 }
  0xf2   :  { %v628_v50 = vmin.f32 %v620_v52, 20.0  ;;  %v624_v32 = vadd.f32 %v623_v55, %v554_v49  ;;  %v625_v56 = vpop.f32.mrb[3].mxu1 }
  0xf3   :  { %1617 = vmatmul.mubr.msk.bf16.vlgmr.msra.gmra.mrb[0].mxu0 %vm480_vm5, %v471_v27  ;;  %v629_v57 = vmin.f32 %v622_v54, 20.0  ;;  %v626_v58 = vadd.f32 %v625_v56, %v558_v14 }
  0xf4   :  { %890 = vmatpush1.bf16.msra.mxu0 %v1652_v26  ;;  %v632_v59 = vmul.f32 1.442695, %v628_v50  ;;  %v630_v60 = vmin.f32 %v624_v32, 20.0 }
  0xf5   :  { %891 = vmatprep.subr.bf16.mxu0 %v1657_v28  ;;  %v634_v25 = vmul.f32 1.442695, %v629_v57  ;;  %v631_v61 = vmin.f32 %v626_v58, 20.0 }
  0xf6   :  { %1766 = vpow2.f32 %v632_v59  ;;  %v636_v62 = vmul.f32 1.442695, %v630_v60 }
  0xf7   :  { %1768 = vpow2.f32 %v634_v25  ;;  %v638_v63 = vmul.f32 1.442695, %v631_v61 }
  0xf8   :  { %892 = vmatpush1.bf16.msra.mxu0 %v1655_v29  ;;  %1770 = vpow2.f32 %v636_v62 }
  0xf9   :  { %893 = vmatprep.subr.bf16.mxu0 %v1660_v13  ;;  %1772 = vpow2.f32 %v638_v63 }
  0xfc   :  { %894 = vmatpush1.bf16.msra.mxu0 %v1658_v31 }
  0xfd   :  { %895 = vmatprep.subr.bf16.mxu0 %v1663_v18 }
 0x100   :  { %896 = vmatpush1.bf16.msra.mxu0 %v1661_v8  ;;  %v1767_v0 = vpop.eup %1766 }
 0x101   :  { %897 = vmatprep.subr.bf16.mxu0 %v1666_v9  ;;  %v1769_v1 = vpop.eup %1768  ;;  %v640_v2 = vadd.f32 1.0, %v1767_v0 }
 0x102   :  { %v1771_v3 = vpop.eup %1770  ;;  %v641_v4 = vadd.f32 1.0, %v1769_v1 }
 0x103   :  { %v1773_v5 = vpop.eup %1772  ;;  %v644_v6 = vmul.f32 %v640_v2, %v640_v2  ;;  %v642_v7 = vadd.f32 1.0, %v1771_v3 }
 0x104   :  { %898 = vmatpush1.bf16.msra.mxu0 %v1664_v33  ;;  %v645_v10 = vmul.f32 %v641_v4, %v641_v4  ;;  %v643_v11 = vadd.f32 1.0, %v1773_v5 }
 0x105   :  { %899 = vmatprep.subr.bf16.mxu0 %v1669_v34  ;;  %v656_v12 = vadd.f32 1.0, %v644_v6  ;;  %v646_v15 = vmul.f32 %v642_v7, %v642_v7  ;;  %v1491_v21 = vadd.f32 -1.0, %v644_v6  ;;  %v1694_v6 = vld [vmem:[#allocation2 + $0x110] ss:$8 sps:$4 sm:$0xff]  }
 0x106   :  { %v657_v16 = vadd.f32 1.0, %v645_v10  ;;  %v647_v17 = vmul.f32 %v643_v11, %v643_v11  ;;  %v1492_v22 = vadd.f32 -1.0, %v645_v10  ;;  %v1699_v10 = vld [vmem:[#allocation2 + $0x124] ss:$8 sps:$4 sm:$0xff]   ;;  %v1697_v11 = vld [vmem:[#allocation2 + $0x120] ss:$8 sps:$4 sm:$0xff]  }
 0x107   :  { %1774 = vrcp.f32 %v656_v12  ;;  %v658_v19 = vadd.f32 1.0, %v646_v15  ;;  %v1493_v23 = vadd.f32 -1.0, %v646_v15  ;;  %v652_v26 = vmul.f32 %v1491_v21, %v620_v52  ;;  %v1702_v12 = vld [vmem:[#allocation2 + $0x134] ss:$8 sps:$4 sm:$0xff]   ;;  %v1700_v15 = vld [vmem:[#allocation2 + $0x130] ss:$8 sps:$4 sm:$0xff]  }
 0x108   :  { %900 = vmatpush1.bf16.msra.mxu0 %v1667_v30  ;;  %1776 = vrcp.f32 %v657_v16  ;;  %v659_v20 = vadd.f32 1.0, %v647_v17  ;;  %v1494_v24 = vadd.f32 -1.0, %v647_v17  ;;  %v653_v27 = vmul.f32 %v1492_v22, %v622_v54  ;;  %v1687_v30 = vld [vmem:[#allocation2 + $0x104] ss:$8 sps:$4 sm:$0xff]   ;;  %v1703_v17 = vld [vmem:[#allocation2 + $0x140] ss:$8 sps:$4 sm:$0xff]  }
 0x109   :  { %901 = vmatprep.subr.bf16.mxu0 %v1672_v35  ;;  %1778 = vrcp.f32 %v658_v19  ;;  %v654_v28 = vmul.f32 %v1493_v23, %v624_v32  ;;  %v1705_v16 = vld [vmem:[#allocation2 + $0x144] ss:$8 sps:$4 sm:$0xff]   ;;  %v1708_v19 = vld [vmem:[#allocation2 + $0x154] ss:$8 sps:$4 sm:$0xff]  }
 0x10a   :  { %1780 = vrcp.f32 %v659_v20  ;;  %v655_v13 = vmul.f32 %v1494_v24, %v626_v58  ;;  %v1706_v20 = vld [vmem:[#allocation2 + $0x150] ss:$8 sps:$4 sm:$0xff]  }
 0x10c   :  { %902 = vmatpush1.bf16.msra.mxu0 %v1670_v36  ;;  %v1685_v36 = vld [vmem:[#allocation2 + $0x100] ss:$8 sps:$4 sm:$0xff]  }
 0x10d   :  { %903 = vmatprep.subr.bf16.mxu0 %v1675_v37 }
 0x110   :  { %904 = vmatpush1.bf16.msra.mxu0 %v1673_v38 }
 0x111   :  { %905 = vmatprep.subr.bf16.mxu0 %v1678_v39  ;;  %v1775_v29 = vpop.eup %1774  ;;  %v1690_v39 = vld [vmem:[#allocation2 + $0x14] ss:$8 sps:$4 sm:$0xff]  }
 0x112   :  { %v1777_v31 = vpop.eup %1776  ;;  %v664_v18 = vmul.f32 %v1775_v29, %v652_v26  ;;  %722 = vmatprep.subr.bf16.mxu1 %v1690_v39  ;;  %v1711_v26 = vld [vmem:[#allocation2 + $0x164] ss:$8 sps:$4 sm:$0xff]   ;;  %v1712_v29 = vld [vmem:[#allocation2 + $0x170] ss:$8 sps:$4 sm:$0xff]  }
 0x113   :  { %v1779_v8 = vpop.eup %1778  ;;  %v665_v9 = vmul.f32 %v1777_v31, %v653_v27  ;;  %v1709_v27 = vld [vmem:[#allocation2 + $0x160] ss:$8 sps:$4 sm:$0xff]   ;;  %v1735_v39 = vld [vmem:[#allocation2 + $0x1e4] ss:$8 sps:$4 sm:$0xff]  }
 0x114   :  { %906 = vmatpush1.bf16.msra.mxu0 %v1676_v40  ;;  %v1781_v33 = vpop.eup %1780  ;;  %v666_v34 = vmul.f32 %v1779_v8, %v654_v28  ;;  %v1688_v40 = vld [vmem:[#allocation2 + $0x10] ss:$8 sps:$4 sm:$0xff]   ;;  %v1714_v28 = vld [vmem:[#allocation2 + $0x174] ss:$8 sps:$4 sm:$0xff]   ;;  %v1715_v31 = vld [vmem:[#allocation2 + $0x180] ss:$8 sps:$4 sm:$0xff]  }
 0x115   :  { %907 = vmatprep.subr.bf16.mxu0 %v1681_v41  ;;  %v667_v35 = vmul.f32 %v1781_v33, %v655_v13  ;;  %723 = vmatpush1.bf16.msra.mxu1 %v1688_v40  ;;  %v1693_v41 = vld [vmem:[#allocation2 + $0x24] ss:$8 sps:$4 sm:$0xff]   ;;  %v1718_v8 = vld [vmem:[#allocation2 + $0x190] ss:$8 sps:$4 sm:$0xff]   ;;  %v1721_v33 = vld [vmem:[#allocation2 + $0x1a0] ss:$8 sps:$4 sm:$0xff]  }
 0x116   :  { %v668_v37 = vpack.c.bf16 %v666_v34, %v664_v18  ;;  %724 = vmatprep.subr.bf16.mxu1 %v1693_v41  ;;  %v1717_v13 = vld [vmem:[#allocation2 + $0x184] ss:$8 sps:$4 sm:$0xff]   ;;  %v1720_v18 = vld [vmem:[#allocation2 + $0x194] ss:$8 sps:$4 sm:$0xff]   ;;  %v1733_v40 = vld [vmem:[#allocation2 + $0x1e0] ss:$8 sps:$4 sm:$0xff]  }
 0x117   :  { %v669_v38 = vpack.c.bf16 %v667_v35, %v665_v9  ;;  %v1723_v9 = vld [vmem:[#allocation2 + $0x1a4] ss:$8 sps:$4 sm:$0xff]   ;;  %v1726_v34 = vld [vmem:[#allocation2 + $0x1b4] ss:$8 sps:$4 sm:$0xff]  }
 0x118   :  { %908 = vmatpush1.bf16.msra.mxu0 %v1679_v43  ;;  %v1691_v43 = vld [vmem:[#allocation2 + $0x20] ss:$8 sps:$4 sm:$0xff]   ;;  %v1729_v35 = vld [vmem:[#allocation2 + $0x1c4] ss:$8 sps:$4 sm:$0xff]   ;;  %v1738_v41 = vld [vmem:[#allocation2 + $0x1f4] ss:$8 sps:$4 sm:$0xff]  }
 0x119   :  { %909 = vmatprep.subr.bf16.mxu0 %v1684_v44  ;;  %1524 = vmatprep.mubr.msk.bf16.mxu0 %vm885_vm6, %v669_v38  ;;  %v1696_v44 = vld [vmem:[#allocation2 + $0x114] ss:$8 sps:$4 sm:$0xff]   ;;  %v1730_v38 = vld [vmem:[#allocation2 + $0x1d0] ss:$8 sps:$4 sm:$0xff]  }
 0x11a   :  { %725 = vmatpush1.bf16.msra.mxu1 %v1691_v43  ;;  %v1736_v43 = vld [vmem:[#allocation2 + $0x1f0] ss:$8 sps:$4 sm:$0xff]  }
 0x11b   :  { %1192 = vmatprep.subr.bf16.mxu1 %v1696_v44  ;;  %v1741_v44 = vld [vmem:[#allocation2 + $0x204] ss:$8 sps:$4 sm:$0xff]  }
 0x11c   :  { %910 = vmatpush1.bf16.msra.mxu0 %v1682_v45 }
 0x11d   :  { %911 = vmatprep.subr.bf16.mxu0 %v1687_v30  ;;  %v1724_v30 = vld [vmem:[#allocation2 + $0x1b0] ss:$8 sps:$4 sm:$0xff]  }
 0x120   :  { %912 = vmatpush1.bf16.msra.mxu0 %v1685_v36  ;;  %v1727_v36 = vld [vmem:[#allocation2 + $0x1c0] ss:$8 sps:$4 sm:$0xff]  }
 0x123   :  { %922 = vmatmul.mubr.bf16.vlgmr.msra.gmra.mrb[4].mxu0 %v668_v37  ;;  %v1732_v37 = vld [vmem:[#allocation2 + $0x1d4] ss:$8 sps:$4 sm:$0xff]  }
 0x1c6   :  { %v518_v45 = vpop.f32.mrb[0].mxu0 }
 0x1c7   :  { %v519_v47 = vadd.f32 %v518_v45, %v32_v42  ;;  %v1618_v49 = vpop.f32.mrb[1].mxu0  ;;  %v1464_v45 = vld [vmem:[%s2003_s2 + $0x3] ss:$8 sm:$0x3] }
 0x1c8   :  { %v521_v14 = vpop.f32.mrb[2].mxu0 }
 0x1c9   :  { %v525_v51 = vmin.f32 %v519_v47, 20.0  ;;  %v522_v52 = vadd.f32 %v521_v14, %v32_v42  ;;  %v1619_v53 = vpop.f32.mrb[3].mxu0  ;;  %v1739_v42 = vld [vmem:[#allocation2 + $0x200] ss:$8 sps:$4 sm:$0xff]   ;;  %v940_v14 = vrot.slane %v1464_v45, %v1977_v48 }
 0x1cb   :  { %v527_v54 = vmul.f32 1.442695, %v525_v51  ;;  %v526_v55 = vmin.f32 %v522_v52, 20.0 }
 0x1cd   :  { %1782 = vpow2.f32 %v527_v54  ;;  %v529_v50 = vmul.f32 1.442695, %v526_v55 }
 0x1cf   :  { %1784 = vpow2.f32 %v529_v50 }
 0x1d7   :  { %v1783_v32 = vpop.eup %1782 }
 0x1d8   :  { %v531_v56 = vadd.f32 1.0, %v1783_v32 }
 0x1d9   :  { %v1785_v57 = vpop.eup %1784 }
 0x1da   :  { %v533_v58 = vmul.f32 %v531_v56, %v531_v56  ;;  %v532_v59 = vadd.f32 1.0, %v1785_v57 }
 0x1dc   :  { %v539_v60 = vadd.f32 1.0, %v533_v58  ;;  %v534_v25 = vmul.f32 %v532_v59, %v532_v59  ;;  %v1484_v62 = vadd.f32 -1.0, %v533_v58 }
 0x1de   :  { %1786 = vrcp.f32 %v539_v60  ;;  %v540_v61 = vadd.f32 1.0, %v534_v25  ;;  %v1485_v63 = vadd.f32 -1.0, %v534_v25  ;;  %v537_v1 = vmul.f32 %v1484_v62, %v519_v47 }
 0x1df   :  { %v936_v47 = vrot.slane %v1464_v45, %v1972_v46  ;;  %v1747_v45 = vld [vmem:[#allocation2 + $0x230] ss:$8 sps:$4 sm:$0xff]  }
 0x1e0   :  { %1788 = vrcp.f32 %v540_v61  ;;  %v538_v2 = vmul.f32 %v1485_v63, %v522_v52 }
 0x1e8   :  { %v1787_v0 = vpop.eup %1786 }
 0x1e9   :  { %v543_v4 = vmul.f32 %v1787_v0, %v537_v1 }
 0x1ea   :  { %v1789_v3 = vpop.eup %1788 }
 0x1eb   :  { %v544_v5 = vmul.f32 %v1789_v3, %v538_v2 }
 0x1ed   :  { %v694_v7 = vpack.c.bf16 %v544_v5, %v543_v4 }
 0x1ef   :  { %1499 = vmatmul.mubr.msk.bf16.vlgmr.msra.gmra.mrb[4].mxu1 %vm581_vm0, %v694_v7 }
 0x1f0   :  { %1193 = vmatpush1.bf16.msra.mxu1 %v1694_v6 }
 0x1f1   :  { %1194 = vmatprep.subr.bf16.mxu1 %v1699_v10 }
 0x1f4   :  { %1195 = vmatpush1.bf16.msra.mxu1 %v1697_v11 }
 0x1f5   :  { %1196 = vmatprep.subr.bf16.mxu1 %v1702_v12 }
 0x1f6   :  { %v923_v21 = vpop.f32.mrb[4].mxu0 }
 0x1f7   :  { %v925_v22 = vpop.f32.mrb[5].mxu0 }
 0x1f8   :  { %1197 = vmatpush1.bf16.msra.mxu1 %v1700_v15  ;;  %v927_v23 = vpop.f32.mrb[6].mxu0 }
 0x1f9   :  { %1198 = vmatprep.subr.bf16.mxu1 %v1705_v16  ;;  %v929_v24 = vpop.f32.mrb[7].mxu0 }
 0x1fc   :  { %1199 = vmatpush1.bf16.msra.mxu1 %v1703_v17 }
 0x1fd   :  { %1200 = vmatprep.subr.bf16.mxu1 %v1708_v19 }
 0x200   :  { %1201 = vmatpush1.bf16.msra.mxu1 %v1706_v20 }
 0x201   :  { %1202 = vmatprep.subr.bf16.mxu1 %v1711_v26 }
 0x204   :  { %1203 = vmatpush1.bf16.msra.mxu1 %v1709_v27 }
 0x205   :  { %1204 = vmatprep.subr.bf16.mxu1 %v1714_v28 }
 0x208   :  { %1205 = vmatpush1.bf16.msra.mxu1 %v1712_v29 }
 0x209   :  { %1206 = vmatprep.subr.bf16.mxu1 %v1717_v13 }
 0x20c   :  { %1207 = vmatpush1.bf16.msra.mxu1 %v1715_v31 }
 0x20d   :  { %1208 = vmatprep.subr.bf16.mxu1 %v1720_v18 }
 0x210   :  { %1209 = vmatpush1.bf16.msra.mxu1 %v1718_v8 }
 0x211   :  { %1210 = vmatprep.subr.bf16.mxu1 %v1723_v9 }
 0x214   :  { %1211 = vmatpush1.bf16.msra.mxu1 %v1721_v33 }
 0x215   :  { %1212 = vmatprep.subr.bf16.mxu1 %v1726_v34 }
 0x218   :  { %1213 = vmatpush1.bf16.msra.mxu1 %v1724_v30 }
 0x219   :  { %1214 = vmatprep.subr.bf16.mxu1 %v1729_v35 }
 0x21c   :  { %1215 = vmatpush1.bf16.msra.mxu1 %v1727_v36 }
 0x21d   :  { %1216 = vmatprep.subr.bf16.mxu1 %v1732_v37 }
 0x220   :  { %1217 = vmatpush1.bf16.msra.mxu1 %v1730_v38 }
 0x221   :  { %1218 = vmatprep.subr.bf16.mxu1 %v1735_v39 }
 0x224   :  { %1219 = vmatpush1.bf16.msra.mxu1 %v1733_v40  ;;  %v1742_v40 = vld [vmem:[#allocation2 + $0x290] ss:$8 sps:$4 sm:$0xff]  }
 0x225   :  { %1220 = vmatprep.subr.bf16.mxu1 %v1738_v41  ;;  %v1743_v41 = vld [vmem:[#allocation2 + $0x210] ss:$8 sps:$4 sm:$0xff]   ;;  %1592 = vmatprep.subr.bf16.mxu0 %v1742_v40 }
 0x226   :  { %1593 = vmatpush3.bf16.msra.mxu0 %v1743_v41 }
 0x228   :  { %1221 = vmatpush1.bf16.msra.mxu1 %v1736_v43  ;;  %v1744_v43 = vld [vmem:[#allocation2 + $0x2a0] ss:$8 sps:$4 sm:$0xff]  }
 0x229   :  { %1222 = vmatprep.subr.bf16.mxu1 %v1741_v44  ;;  %v1745_v44 = vld [vmem:[#allocation2 + $0x220] ss:$8 sps:$4 sm:$0xff]   ;;  %1594 = vmatprep.subr.bf16.mxu0 %v1744_v43 }
 0x22a   :  { %1595 = vmatpush3.bf16.msra.mxu0 %v1745_v44 }
 0x22c   :  { %1223 = vmatpush1.bf16.msra.mxu1 %v1739_v42  ;;  %v1746_v42 = vld [vmem:[#allocation2 + $0x2b0] ss:$8 sps:$4 sm:$0xff]  }
 0x22d   :  { %1596 = vmatprep.subr.bf16.mxu0 %v1746_v42 }
 0x22e   :  { %1597 = vmatpush3.bf16.msra.mxu0 %v1747_v45 }
 0x2c2   :  { %v756_v49 = vpop.f32.mrb[4].mxu1 }
 0x2c3   :  { %v924_v51 = vadd.f32 %v923_v21, %v756_v49  ;;  %v758_v52 = vpop.f32.mrb[5].mxu1  ;;  %v1749_v49 = vld [vmem:[#allocation2 + $0x240] ss:$8 sps:$4 sm:$0xff]  }
 0x2c4   :  { %v926_v53 = vadd.f32 %v925_v22, %v758_v52  ;;  %v760_v54 = vpop.f32.mrb[6].mxu1  ;;  %v1752_v52 = vld [vmem:[#allocation2 + $0x2e0] ss:$8 sps:$4 sm:$0xff]  }
 0x2c5   :  { %v943_v55 = vadd.f32 %v936_v47, %v924_v51  ;;  %v928_v50 = vadd.f32 %v927_v23, %v760_v54  ;;  %v762_v32 = vpop.f32.mrb[7].mxu1  ;;  %v1751_v51 = vld [vmem:[#allocation2 + $0x250] ss:$8 sps:$4 sm:$0xff]  }
 0x2c6   :  { %v944_v56 = vadd.f32 %v940_v14, %v926_v53  ;;  %v930_v57 = vadd.f32 %v929_v24, %v762_v32  ;;  %v1753_v53 = vld [vmem:[#allocation2 + $0x260] ss:$8 sps:$4 sm:$0xff]   ;;  %v1754_v54 = vld [vmem:[#allocation2 + $0x2f0] ss:$8 sps:$4 sm:$0xff]  }
 0x2c7   :  { %v947_v58 = vmin.f32 %v943_v55, 20.0  ;;  %v945_v59 = vadd.f32 %v936_v47, %v928_v50  ;;  %v1748_v47 = vld [vmem:[#allocation2 + $0x2c0] ss:$8 sps:$4 sm:$0xff]  }
 0x2c8   :  { %v948_v60 = vmin.f32 %v944_v56, 20.0  ;;  %v946_v25 = vadd.f32 %v940_v14, %v930_v57  ;;  %1598 = vmatprep.subr.bf16.mxu0 %v1748_v47  ;;  %v1750_v14 = vld [vmem:[#allocation2 + $0x2d0] ss:$8 sps:$4 sm:$0xff]   ;;  %v1756_v50 = vld [vmem:[#allocation2 + $0x300] ss:$8 sps:$4 sm:$0xff]  }
 0x2c9   :  { %v951_v61 = vmul.f32 1.442695, %v947_v58  ;;  %v949_v62 = vmin.f32 %v945_v59, 20.0  ;;  %1599 = vmatpush3.bf16.msra.mxu0 %v1749_v49  ;;  %v1757_v32 = vld [vmem:[#allocation2 + $0x280] ss:$8 sps:$4 sm:$0xff]  }
 0x2ca   :  { %v953_v63 = vmul.f32 1.442695, %v948_v60  ;;  %v950_v0 = vmin.f32 %v946_v25, 20.0  ;;  %1600 = vmatprep.subr.bf16.mxu0 %v1750_v14  ;;  %v39_v47 = vld [vmem:[%s2003_s2 + $0x5] ss:$0 sm:$0xff] }
 0x2cb   :  { %1790 = vpow2.f32 %v951_v61  ;;  %v955_v1 = vmul.f32 1.442695, %v949_v62 }
 0x2cc   :  { %1792 = vpow2.f32 %v953_v63  ;;  %v957_v2 = vmul.f32 1.442695, %v950_v0 }
 0x2cd   :  { %1794 = vpow2.f32 %v955_v1  ;;  %1601 = vmatpush3.bf16.msra.mxu0 %v1751_v51 }
 0x2ce   :  { %1796 = vpow2.f32 %v957_v2  ;;  %1602 = vmatprep.subr.bf16.mxu0 %v1752_v52 }
 0x2d1   :  { %1603 = vmatpush3.bf16.msra.mxu0 %v1753_v53 }
 0x2d2   :  { %1604 = vmatprep.subr.bf16.mxu0 %v1754_v54 }
 0x2d5   :  { %v1791_v3 = vpop.eup %1790 }
 0x2d6   :  { %v1793_v4 = vpop.eup %1792  ;;  %v959_v5 = vadd.f32 1.0, %v1791_v3 }
 0x2d7   :  { %v1795_v6 = vpop.eup %1794  ;;  %v960_v7 = vadd.f32 1.0, %v1793_v4 }
 0x2d8   :  { %v1797_v10 = vpop.eup %1796  ;;  %v963_v11 = vmul.f32 %v959_v5, %v959_v5  ;;  %v961_v12 = vadd.f32 1.0, %v1795_v6 }
 0x2d9   :  { %v964_v15 = vmul.f32 %v960_v7, %v960_v7  ;;  %v962_v16 = vadd.f32 1.0, %v1797_v10 }
 0x2da   :  { %v975_v17 = vadd.f32 1.0, %v963_v11  ;;  %v965_v19 = vmul.f32 %v961_v12, %v961_v12  ;;  %v1525_v24 = vadd.f32 -1.0, %v963_v11 }
 0x2db   :  { %v976_v20 = vadd.f32 1.0, %v964_v15  ;;  %v966_v21 = vmul.f32 %v962_v16, %v962_v16  ;;  %v1526_v27 = vadd.f32 -1.0, %v964_v15 }
 0x2dc   :  { %1798 = vrcp.f32 %v975_v17  ;;  %v977_v22 = vadd.f32 1.0, %v965_v19  ;;  %v1527_v26 = vadd.f32 -1.0, %v965_v19  ;;  %v971_v31 = vmul.f32 %v1525_v24, %v943_v55  ;;  %v1755_v55 = vld [vmem:[#allocation2 + $0x270] ss:$8 sps:$4 sm:$0xff]  }
 0x2dd   :  { %1800 = vrcp.f32 %v976_v20  ;;  %v978_v23 = vadd.f32 1.0, %v966_v21  ;;  %v1528_v28 = vadd.f32 -1.0, %v966_v21  ;;  %v972_v9 = vmul.f32 %v1526_v27, %v944_v56  ;;  %1605 = vmatpush3.bf16.msra.mxu0 %v1755_v55  ;;  %v1465_v56 = vld [vmem:[%s2003_s2 + $0x4] ss:$8 sm:$0x3] }
 0x2de   :  { %1802 = vrcp.f32 %v977_v22  ;;  %v973_v18 = vmul.f32 %v1527_v26, %v945_v59  ;;  %1606 = vmatprep.subr.bf16.mxu0 %v1756_v50  ;;  %v1025_v57 = vrot.slane %v1465_v56, %v1972_v46  ;;  %v1029_v58 = vrot.slane %v1465_v56, %v1977_v48 }
 0x2df   :  { %1804 = vrcp.f32 %v978_v23  ;;  %v974_v33 = vmul.f32 %v1528_v28, %v946_v25 }
 0x2e1   :  { %1607 = vmatpush3.bf16.msra.mxu0 %v1757_v32 }
 0x2e6   :  { %v1799_v29 = vpop.eup %1798 }
 0x2e7   :  { %v1801_v13 = vpop.eup %1800  ;;  %v983_v30 = vmul.f32 %v1799_v29, %v971_v31 }
 0x2e8   :  { %v1803_v8 = vpop.eup %1802  ;;  %v984_v36 = vmul.f32 %v1801_v13, %v972_v9 }
 0x2e9   :  { %v1805_v34 = vpop.eup %1804  ;;  %v985_v35 = vmul.f32 %v1803_v8, %v973_v18 }
 0x2ea   :  { %v986_v37 = vmul.f32 %v1805_v34, %v974_v33 }
 0x2eb   :  { %v987_v38 = vpack.c.bf16 %v985_v35, %v983_v30 }
 0x2ec   :  { %v988_v39 = vpack.c.bf16 %v986_v37, %v984_v36 }
 0x2ee   :  { %1224 = vmatprep.mubr.bf16.mxu1 %v988_v39 }
 0x2ef   :  { %1225 = vmatmul.mubr.bf16.vlgmr.msra.gmra.mrb[8].mxu1 %v987_v38 }
 0x3c2   :  { %v1226_v59 = vpop.f32.mrb[8].mxu1 }
 0x3c3   :  { %v1227_v60 = vadd.f32 %v1226_v59, %v1025_v57  ;;  %v1228_v25 = vpop.f32.mrb[9].mxu1 }
 0x3c4   :  { %v1229_v61 = vadd.f32 %v1228_v25, %v1029_v58  ;;  %v1230_v62 = vpop.f32.mrb[10].mxu1 }
 0x3c5   :  { %v1235_v63 = vmin.f32 %v1227_v60, 20.0  ;;  %v1231_v0 = vadd.f32 %v1230_v62, %v1025_v57  ;;  %v1232_v1 = vpop.f32.mrb[11].mxu1 }
 0x3c6   :  { %v1236_v2 = vmin.f32 %v1229_v61, 20.0  ;;  %v1233_v3 = vadd.f32 %v1232_v1, %v1029_v58 }
 0x3c7   :  { %v1239_v4 = vmul.f32 1.442695, %v1235_v63  ;;  %v1237_v5 = vmin.f32 %v1231_v0, 20.0 }
 0x3c8   :  { %v1241_v6 = vmul.f32 1.442695, %v1236_v2  ;;  %v1238_v7 = vmin.f32 %v1233_v3, 20.0 }
 0x3c9   :  { %1806 = vpow2.f32 %v1239_v4  ;;  %v1243_v10 = vmul.f32 1.442695, %v1237_v5 }
 0x3ca   :  { %1808 = vpow2.f32 %v1241_v6  ;;  %v1245_v46 = vmul.f32 1.442695, %v1238_v7 }
 0x3cb   :  { %1810 = vpow2.f32 %v1243_v10 }
 0x3cc   :  { %1812 = vpow2.f32 %v1245_v46 }
 0x3d3   :  { %v1807_v48 = vpop.eup %1806 }
 0x3d4   :  { %v1809_v11 = vpop.eup %1808  ;;  %v1247_v12 = vadd.f32 1.0, %v1807_v48 }
 0x3d5   :  { %v1811_v15 = vpop.eup %1810  ;;  %v1248_v16 = vadd.f32 1.0, %v1809_v11 }
 0x3d6   :  { %v1813_v17 = vpop.eup %1812  ;;  %v1251_v19 = vmul.f32 %v1247_v12, %v1247_v12  ;;  %v1249_v20 = vadd.f32 1.0, %v1811_v15 }
 0x3d7   :  { %v1252_v21 = vmul.f32 %v1248_v16, %v1248_v16  ;;  %v1250_v22 = vadd.f32 1.0, %v1813_v17 }
 0x3d8   :  { %v1263_v23 = vadd.f32 1.0, %v1251_v19  ;;  %v1253_v24 = vmul.f32 %v1249_v20, %v1249_v20  ;;  %v1561_v13 = vadd.f32 -1.0, %v1251_v19 }
 0x3d9   :  { %v1264_v26 = vadd.f32 1.0, %v1252_v21  ;;  %v1254_v27 = vmul.f32 %v1250_v22, %v1250_v22  ;;  %v1562_v18 = vadd.f32 -1.0, %v1252_v21 }
 0x3da   :  { %1814 = vrcp.f32 %v1263_v23  ;;  %v1265_v28 = vadd.f32 1.0, %v1253_v24  ;;  %v1563_v31 = vadd.f32 -1.0, %v1253_v24  ;;  %v1259_v34 = vmul.f32 %v1561_v13, %v1227_v60 }
 0x3db   :  { %1816 = vrcp.f32 %v1264_v26  ;;  %v1266_v29 = vadd.f32 1.0, %v1254_v27  ;;  %v1564_v8 = vadd.f32 -1.0, %v1254_v27  ;;  %v1260_v36 = vmul.f32 %v1562_v18, %v1229_v61 }
 0x3dc   :  { %1818 = vrcp.f32 %v1265_v28  ;;  %v1261_v30 = vmul.f32 %v1563_v31, %v1231_v0 }
 0x3dd   :  { %1820 = vrcp.f32 %v1266_v29  ;;  %v1262_v37 = vmul.f32 %v1564_v8, %v1233_v3 }
 0x3e4   :  { %v1815_v9 = vpop.eup %1814 }
 0x3e5   :  { %v1817_v33 = vpop.eup %1816  ;;  %v1271_v39 = vmul.f32 %v1815_v9, %v1259_v34 }
 0x3e6   :  { %v1819_v35 = vpop.eup %1818  ;;  %v1272_v41 = vmul.f32 %v1817_v33, %v1260_v36 }
 0x3e7   :  { %v1821_v38 = vpop.eup %1820  ;;  %v1273_v40 = vmul.f32 %v1819_v35, %v1261_v30 }
 0x3e8   :  { %v1274_v43 = vmul.f32 %v1821_v38, %v1262_v37 }
 0x3e9   :  { %v1275_v44 = vpack.c.bf16 %v1273_v40, %v1271_v39 }
 0x3ea   :  { %v1276_v42 = vpack.c.bf16 %v1274_v43, %v1272_v41 }
 0x3ec   :  { %1437 = vmatprep.mubr.bf16.mxu0 %v1276_v42 }
 0x3ed   :  { %1438 = vmatmul.mubr.bf16.vlgmr.msra.gmra.mrb[8].mxu0 %v1275_v44 }
 0x4c0   :  { %v1608_v45 = vpop.f32.mrb[8].mxu0 }
 0x4c1   :  { %v1609_v49 = vpop.f32.mrb[9].mxu0 }
 0x4c2   :  { %v1610_v14 = vadd.f32 %v1609_v49, %v1608_v45  ;;  %v1611_v51 = vpop.f32.mrb[10].mxu0 }
 0x4c3   :  { %v1612_v52 = vpop.f32.mrb[11].mxu0 }
 0x4c4   :  { %v1440_v53 = vadd.f32 %v1610_v14, %v39_v47  ;;  %v1613_v54 = vadd.f32 %v1612_v52, %v1611_v51 }
 0x4c6   :  { %v1443_v55 = vadd.f32 %v1613_v54, %v39_v47  ;;  %1822 = vtanh.f32 %v1440_v53 }
 0x4c8   :  { %1824 = vtanh.f32 %v1443_v55 }
 0x4d0   :  { %v1823_v50 = vpop.eup %1822 }
 0x4d2   :  { %v1825_v32 = vpop.eup %1824 }
 0x4d3   :  { %v1588_v56 = vpack.c.bf16 %v1825_v32, %v1823_v50 }
 0x4d5   :  { %1589 = vst [vmem:[%s2004_s3] sm:$0xff] %v1588_v56  }
 0x4d6   :  { %1462 = vsyncpa [#allocation3], 1 }

</bundles_post_ra>
